<compile_context>
chip_gen: v7x
topology: tpu7x:2x2x1
jax: 0.10.0
libtpu: 0.0.40
codegen_flags: <defaults>
</compile_context>

<pallas_src>
import jax
import jax.numpy as jnp
from jax.experimental import pallas as pl
from jax.experimental.pallas import tpu as pltpu


def smallnet_kernel(x_ref, w1_ref, p_ref, o_ref):
    H = w1_ref.shape[1]
    p = p_ref[...]                 # (2, H+1): row0 = [b1 | b2], row1 = [w2^T | 0]
    b1 = p[0:1, :H]                # (1, H) -- broadcasts over the batch (sublane) axis
    b2 = p[0:1, H:H + 1]           # (1, 1)
    w2 = p[1:2, :H]                # (1, H) -- second-layer weights as a lane row

    # hidden = relu(x @ W1 + b1)   -- MXU matmul with f32 accumulation + VPU max
    h = jnp.dot(x_ref[...], w1_ref[...], preferred_element_type=jnp.float32)
    h = jnp.maximum(h + b1, 0.0)

    # out = hidden @ W2 + b2, computed as VPU multiply + XLU lane reduce (H=3):
    # cheaper than a second MXU matmul that would use ~3/256 of the array and
    # pay a full push/pop on the critical path; VALU/XLU slots are idle here.
    out = jnp.sum(h * w2, axis=-1, keepdims=True) + b2
    o_ref[...] = out.astype(o_ref.dtype)


def smallnet_forward(x, w1, b1, w2, b2, *, batch_tile=512):
    B, D = x.shape
    H = w1.shape[1]

    # Tile over the batch; for the toy B=8 this degenerates to a single block.
    TB = min(batch_tile, B)
    grid = (pl.cdiv(B, TB),)

    # Pack b1 / w2 / b2 into one (2, H+1) array -> one tiny DMA instead of
    # three padded (8,128) tiles.
    b1r = jnp.reshape(b1, (1, H)).astype(jnp.float32)
    w2r = jnp.reshape(w2, (1, H)).astype(jnp.float32)
    b2r = jnp.reshape(b2, (1, 1)).astype(jnp.float32)
    row0 = jnp.concatenate([b1r, b2r], axis=1)                              # [b1 | b2]
    row1 = jnp.concatenate([w2r, jnp.zeros((1, 1), jnp.float32)], axis=1)   # [w2 | 0 ]
    params = jnp.concatenate([row0, row1], axis=0)                          # (2, H+1)

    flops = 2 * B * D * H + 5 * B * H
    bytes_accessed = 4 * (B * D + D * H + 2 * (H + 1) + B)

    return pl.pallas_call(
        smallnet_kernel,
        out_shape=jax.ShapeDtypeStruct((B, 1), jnp.float32),
        grid=grid,
        in_specs=[
            pl.BlockSpec((TB, D), lambda i: (i, 0)),       # stream batch tiles of x
            pl.BlockSpec((D, H), lambda i: (0, 0)),        # W1 resident across the grid
            pl.BlockSpec((2, H + 1), lambda i: (0, 0)),    # packed b1/w2/b2 resident
        ],
        out_specs=pl.BlockSpec((TB, 1), lambda i: (i, 0)),
        compiler_params=pltpu.CompilerParams(
            dimension_semantics=("parallel",),             # shards batch across TCs on v7x
        ),
        cost_estimate=pl.CostEstimate(
            flops=flops, transcendentals=0, bytes_accessed=bytes_accessed),
    )(x, w1, params)


if __name__ == "__main__":
    # Small shapes consistent with the module: input_dim=32, hidden_dim=3, out=1.
    B, D, H = 8, 32, 3

    key = jax.random.PRNGKey(0)
    kx, kw1, kb1, kw2, kb2 = jax.random.split(key, 5)

    # Deterministic init mimicking nn.Linear's U(-1/sqrt(fan_in), 1/sqrt(fan_in)).
    bound1 = 1.0 / jnp.sqrt(jnp.float32(D))
    bound2 = 1.0 / jnp.sqrt(jnp.float32(H))
    x = jax.random.normal(kx, (B, D), dtype=jnp.float32)
    w1 = jax.random.uniform(kw1, (D, H), jnp.float32, -bound1, bound1)
    b1 = jax.random.uniform(kb1, (H,), jnp.float32, -bound1, bound1)
    w2 = jax.random.uniform(kw2, (H, 1), jnp.float32, -bound2, bound2)
    b2 = jax.random.uniform(kb2, (1,), jnp.float32, -bound2, bound2)

    out = jax.block_until_ready(smallnet_forward(x, w1, b1, w2, b2))

    # Pure-JAX reference check of the forward-pass semantics.
    ref = jnp.maximum(x @ w1 + b1[None, :], 0.0) @ w2 + b2[None, :]
    assert out.shape == (B, 1)
    assert jnp.allclose(out, ref, atol=1e-5, rtol=1e-5)

    print("KERNEL_OK")
</pallas_src>

<mosaic_0001>
module attributes {stable_mosaic.version = 11 : i64} {
  func.func @smallnet_kernel(%arg0: i32, %arg1: memref<8x32xf32, #tpu.memory_space<vmem>>, %arg2: memref<32x3xf32, #tpu.memory_space<vmem>>, %arg3: memref<2x4xf32, #tpu.memory_space<vmem>>, %arg4: memref<8x1xf32, #tpu.memory_space<vmem>>) attributes {dimension_semantics = [#tpu.dimension_semantics<parallel>], iteration_bounds = array<i64: 1>, scalar_prefetch = 0 : i64, scratch_operands = 0 : i64, tpu.core_type = #tpu.core_type<tc>, window_params = [{transform_indices = @transform_0, window_bounds = array<i64: 8, 32>}, {pipeline_mode = #tpu.pipeline_mode<synchronous>, transform_indices = @transform_1, window_bounds = array<i64: 32, 3>}, {pipeline_mode = #tpu.pipeline_mode<synchronous>, transform_indices = @transform_2, window_bounds = array<i64: 2, 4>}, {transform_indices = @transform_3, window_bounds = array<i64: 8, 1>}]} {
    %c0 = arith.constant 0 : index
    %c0_0 = arith.constant 0 : index
    %0 = vector.load %arg3[%c0, %c0_0] : memref<2x4xf32, #tpu.memory_space<vmem>>, vector<2x4xf32>
    %1 = vector.extract_strided_slice %0 {offsets = [0, 0], sizes = [1, 3], strides = [1, 1]} : vector<2x4xf32> to vector<1x3xf32>
    %2 = vector.extract_strided_slice %0 {offsets = [0, 3], sizes = [1, 1], strides = [1, 1]} : vector<2x4xf32> to vector<1x1xf32>
    %3 = vector.extract_strided_slice %0 {offsets = [1, 0], sizes = [1, 3], strides = [1, 1]} : vector<2x4xf32> to vector<1x3xf32>
    %c0_1 = arith.constant 0 : index
    %c0_2 = arith.constant 0 : index
    %4 = vector.load %arg1[%c0_1, %c0_2] : memref<8x32xf32, #tpu.memory_space<vmem>>, vector<8x32xf32>
    %c0_3 = arith.constant 0 : index
    %c0_4 = arith.constant 0 : index
    %5 = vector.load %arg2[%c0_3, %c0_4] : memref<32x3xf32, #tpu.memory_space<vmem>>, vector<32x3xf32>
    %cst = arith.constant dense<0.000000e+00> : vector<8x3xf32>
    %6 = tpu.matmul %4, %5, %cst {dimension_numbers = #tpu.dot_dimension_numbers<[1], [0], [0], [1], [0, 0, 1, 1], [], []>} : vector<8x32xf32>, vector<32x3xf32>, vector<8x3xf32> -> vector<8x3xf32>
    %7 = vector.broadcast %1 : vector<1x3xf32> to vector<8x3xf32>
    %8 = arith.addf %6, %7 : vector<8x3xf32>
    %cst_5 = arith.constant 0.000000e+00 : f32
    %9 = vector.broadcast %cst_5 : f32 to vector<8x3xf32>
    %10 = arith.maximumf %8, %9 : vector<8x3xf32>
    %11 = vector.broadcast %3 : vector<1x3xf32> to vector<8x3xf32>
    %12 = arith.mulf %10, %11 : vector<8x3xf32>
    %cst_6 = arith.constant dense<0.000000e+00> : vector<8xf32>
    %13 = vector.multi_reduction <add>, %12, %cst_6 [1] : vector<8x3xf32> to vector<8xf32>
    %14 = vector.shape_cast %13 : vector<8xf32> to vector<8x1xf32>
    %15 = vector.broadcast %2 : vector<1x1xf32> to vector<8x1xf32>
    %16 = arith.addf %14, %15 : vector<8x1xf32>
    %c0_7 = arith.constant 0 : index
    %c0_8 = arith.constant 0 : index
    %17 = vector.load %arg4[%c0_7, %c0_8] : memref<8x1xf32, #tpu.memory_space<vmem>>, vector<8x1xf32>
    tpu.vector_store %arg4[%c0_7, %c0_8], %16 {strides = array<i32>} : memref<8x1xf32, #tpu.memory_space<vmem>>, vector<8x1xf32>,
    return
  }
  func.func @transform_0(%arg0: i32) -> (i32, i32) {
    %c0_i32 = arith.constant 0 : i32
    %c0_i32_0 = arith.constant 0 : i32
    return %arg0, %c0_i32 : i32, i32
  }
  func.func @transform_1(%arg0: i32) -> (i32, i32) {
    %c0_i32 = arith.constant 0 : i32
    %c0_i32_0 = arith.constant 0 : i32
    %c0_i32_1 = arith.constant 0 : i32
    return %c0_i32, %c0_i32_0 : i32, i32
  }
  func.func @transform_2(%arg0: i32) -> (i32, i32) {
    %c0_i32 = arith.constant 0 : i32
    %c0_i32_0 = arith.constant 0 : i32
    %c0_i32_1 = arith.constant 0 : i32
    return %c0_i32, %c0_i32_0 : i32, i32
  }
  func.func @transform_3(%arg0: i32) -> (i32, i32) {
    %c0_i32 = arith.constant 0 : i32
    %c0_i32_0 = arith.constant 0 : i32
    return %arg0, %c0_i32 : i32, i32
  }
}

</mosaic_0001>

<bundles_post_ra>
// kernel: tpu_custom_call.1
= control target key start
LH: loop header
LB: loop body
LE: loop exit
PB: predicated region body
PF: predicated region fallthrough
CT: control target
= control target key end

     0   :  { %v146_v0 = vmov 0.0|0.0   ;;  %vm147_vm0 = vmmov 0   ;;  %v148_v4 = vmov 0.0   ;;  %vm24_vm1 = vcmask 261120   ;;  %s191_s1 = inlined_call_operand.vmem [shape: f32[32,3], index: 1, kind: input, shape index: {}]   ;;  %s192_s0 = inlined_call_operand.vmem [shape: f32[8,32], index: 0, kind: input, shape index: {}]   ;;  %s193_s2 = inlined_call_operand.vmem [shape: f32[2,4], index: 2, kind: input, shape index: {}]   ;;  %s194_s3 = inlined_call_operand.vmem [shape: f32[8,1], index: 3, kind: output, shape index: {}]  }
   0x1   :  { %136 = vmatprep.subr.bf16.mxu0 %v146_v0  ;;  %v16_v1 = vld [vmem:[%s191_s1] sm:$0xff]  ;;  %v17_v2 = vld [vmem:[%s191_s1 + $0x8] sm:$0xff]  ;;  %v18_v3 = vld [vmem:[%s191_s1 + $0x10] sm:$0xff]  ;;  %133 = vmatprep.mubr.msk.f32.mxu0 %vm147_vm0, %v148_v4  ;;  %v20_v9 = vlaneseq  ;;  %vm104_vm2 = vcmask 23552   ;;  %vm113_vm3 = vcmask 7168  }
   0x2   :  { %v137_v5 = vpack.c.bf16 %v17_v2, %v16_v1  ;;  %v19_v6 = vld [vmem:[%s191_s1 + $0x18] sm:$0xff]  ;;  %v15_v8 = vld [vmem:[%s192_s0] sm:$0xff]  ;;  %s149_s0 = smov 125  }
   0x3   :  { %v140_v7 = vpack.c.bf16 %v19_v6, %v18_v3  ;;  %v21_v10 = vshrl.u32 %v20_v9, 7  ;;  %v14_v12 = vld [vmem:[%s193_s2] sm:$0x3] }
   0x4   :  { %138 = vmatpush3.bf16.msra.mxu0 %v137_v5 }
   0x5   :  { %139 = vmatprep.subr.bf16.mxu0 %v146_v0  ;;  %v22_v11 = vsub.s32 0, %v21_v10  ;;  %v101_v14 = vsub.s32 1, %v21_v10 }
   0x7   :  { %v23_v13 = vrot.slane %v14_v12, %v22_v11  ;;  %v102_v18 = vrot.slane %v14_v12, %v101_v14 }
   0x8   :  { %141 = vmatpush3.bf16.msra.mxu0 %v140_v7 }
   0xb   :  { %134 = vmatmul.mubr.msk.f32.vlgmr.msra.gmra.mrb[0].mxu0 %vm24_vm1, %v15_v8 }
  0xde   :  { %v94_v15 = vpop.f32.mrb[0].mxu0 }
  0xdf   :  { %v95_v16 = vadd.f32 %v94_v15, %v23_v13  ;;  %v135_v17 = vpop.f32.mrb[1].mxu0 }
  0xe1   :  { %v98_v19 = vmax.f32 %v95_v16, 0.0 }
  0xe3   :  { %v103_v20 = vmul.f32 %v102_v18, %v98_v19 }
  0xe5   :  { %v105_v21 = vsel %vm104_vm2, %v103_v20, 0.0 }
  0xe6   :  { %106 = vadd.xlane.f32.xlu0 %v105_v21 }
 0x173   :  { %v107_v22 = vpop.xlane.xlu0 %106 }
 0x174   :  { %v108_v23 = vadd.f32 %v107_v22, %v23_v13 }
 0x176   :  { %110 = vrot.lane.b32.xlu0 %v108_v23, %s149_s0 }
 0x1e8   :  { %v111_v24 = vpop.permute.xlu0 %110 }
 0x1e9   :  { %114 = vst.msk [vmem:[%s194_s3] sm:$0xff] %vm113_vm3, %v111_v24 }

</bundles_post_ra>
